<compile_context>
chip_gen: v7x
topology: tpu7x:2x2x1
jax: 0.10.0
libtpu: 0.0.40
codegen_flags: <defaults>
</compile_context>

<pallas_src>
import math

import jax
import jax.numpy as jnp
from jax.experimental import pallas as pl
from jax.experimental.pallas import tpu as pltpu

PACK = 4  # original rows packed per 128-lane row (hidden=32 -> 4*32 = 128 lanes)


def _round_up(x, m):
    return ((x + m - 1) // m) * m


def _phys_vmem_bytes(shape, itemsize):
    """Physical VMEM footprint of one buffer: lane dim pads to 128, sublanes to 8."""
    if len(shape) == 1:
        return _round_up(shape[0] * itemsize, 4096)
    lanes = _round_up(shape[-1], 128)
    sub = _round_up(shape[-2], 8)
    lead = math.prod(shape[:-2]) if len(shape) > 2 else 1
    return lead * sub * lanes * itemsize


# ---------------------------------------------------------------------------
# Pallas kernel: everything on 128-lane-dense packed rows.
#   lanes [32g, 32g+32) of packed row i  ==  original row 4*i + g.
# Block-diagonal weights / group-averaging matrix keep the 4 groups independent.
# ---------------------------------------------------------------------------
def _linear_projector_kernel(
    x_img_ref,    # [T, 4*D_img]   f32   packed img_emb rows
    x_text_ref,   # [T, 4*D_text]  f32   packed track_name_emb rows
    audio_ref,    # [T, 128]       f32   packed audio_emb rows (ADD feature)
    ids_ref,      # [T, 4]         i32   packed genre ids
    w_img_ref,    # [4*D_img, 128] bf16  block-diag composed weight (resident)
    w_text_ref,   # [4*D_text,128] bf16  block-diag composed weight (resident)
    tbl_ref,      # [4, Vp, 128]   f32   per-group genre->hidden table (+bias) (resident)
    gmat_ref,     # [128, 128]     f32   per-32-lane-group averaging matrix (resident)
    gamma_ref,    # [1, 128]       f32   LayerNorm weight, tiled x4 (resident)
    beta_ref,     # [1, 128]       f32   LayerNorm bias,  tiled x4 (resident)
    out_ref,      # [T, 128]       f32   packed projection
):
    # ADD feature + composed dense projections (bf16 cast in-register, MXU is idle
    # at this arithmetic intensity so precision of the matmul is the only trade-off).
    proj = audio_ref[...]
    proj = proj + jnp.dot(
        x_img_ref[...].astype(jnp.bfloat16), w_img_ref[...],
        preferred_element_type=jnp.float32)
    proj = proj + jnp.dot(
        x_text_ref[...].astype(jnp.bfloat16), w_text_ref[...],
        preferred_element_type=jnp.float32)

    # Genre embedding lookup (Embedding -> fc, bias folded in) as 4 tiny one-hot
    # matmuls against the per-group table: no gather, no separate HBM stream.
    ids = ids_ref[...]                                    # (T, 4) int32
    rows = ids.shape[0]
    vocab_pad = tbl_ref.shape[1]
    iota = jax.lax.broadcasted_iota(jnp.int32, (rows, vocab_pad), 1)
    for g in range(ids.shape[1]):
        one_hot = (ids[:, g:g + 1] == iota).astype(jnp.float32)       # (T, Vp)
        proj = proj + jnp.dot(one_hot, tbl_ref[g],
                              preferred_element_type=jnp.float32)

    # LayerNorm over each 32-lane group (== per original row), f32 throughout
    # (v5e has no bf16 VPU/EUP).  Group mean / var via the averaging matmul.
    mean = jnp.dot(proj, gmat_ref[...], preferred_element_type=jnp.float32)
    centered = proj - mean
    var = jnp.dot(centered * centered, gmat_ref[...],
                  preferred_element_type=jnp.float32)
    normed = centered * jax.lax.rsqrt(var + 1e-5)
    out_ref[...] = (normed * gamma_ref[...] + beta_ref[...]).astype(out_ref.dtype)


def linear_projector(
    genre_ids,       # [N] int
    img_emb,         # [N, D_img]  f32
    track_name_emb,  # [N, D_text] f32
    audio_emb,       # [N, H]      f32
    params,
    *,
    block_rows=8192,    # tile size in ORIGINAL rows (review: 4-8K amortizes step cost)
):
    N, d_img = img_emb.shape
    d_text = track_name_emb.shape[1]
    H = audio_emb.shape[1]
    if PACK * H != 128:
        raise ValueError("lane-dense packing assumes hidden_size == 32")

    # --- exact algebraic pre-composition (no nonlinearity between the fcs) ---
    w_img_eff = params["w_album_T"] @ params["w_fc_album_T"]      # (D_img,  H)
    w_text_eff = params["w_text_T"] @ params["w_fc_text_T"]       # (D_text, H)
    b_eff = (params["b_album"] @ params["w_fc_album_T"]
             + params["b_text"] @ params["w_fc_text_T"]
             + params["b_fc"])                                    # (1, H)
    vocab = params["genre_emb_table"].shape[0]
    vocab_pad = _round_up(vocab, 8)
    # genre Embedding -> fc collapses to a tiny lookup table; fold b_eff in
    # (exactly one genre row is selected per example, so the bias lands once).
    genre_tbl = params["genre_emb_table"] @ params["w_fc_genre_T"] + b_eff   # (vocab, H)

    # --- lane-dense packing: 4 original rows -> one 128-lane packed row -------
    n_rem = (-N) % PACK
    if n_rem:
        # TODO(synk): supply N % 4 == 0 upstream to keep this path (a full copy) cold.
        genre_ids = jnp.pad(genre_ids, (0, n_rem))
        img_emb = jnp.pad(img_emb, ((0, n_rem), (0, 0)))
        track_name_emb = jnp.pad(track_name_emb, ((0, n_rem), (0, 0)))
        audio_emb = jnp.pad(audio_emb, ((0, n_rem), (0, 0)))
    n_pad = N + n_rem
    n4 = n_pad // PACK

    # contiguous (row-major) reshapes: free, no HBM copy
    x_img4 = img_emb.reshape(n4, PACK * d_img)
    x_text4 = track_name_emb.reshape(n4, PACK * d_text)
    audio4 = audio_emb.reshape(n4, PACK * H)
    ids4 = genre_ids.astype(jnp.int32).reshape(n4, PACK)

    # block-diagonal composed weights keep the 4 packed groups independent
    def block_diag(w):
        d, h = w.shape
        out = jnp.zeros((PACK * d, PACK * h), w.dtype)
        for g in range(PACK):
            out = out.at[g * d:(g + 1) * d, g * h:(g + 1) * h].set(w)
        return out

    w_img_bd = block_diag(w_img_eff).astype(jnp.bfloat16)          # (4*D_img,  128)
    w_text_bd = block_diag(w_text_eff).astype(jnp.bfloat16)        # (4*D_text, 128)

    tbl_bd = jnp.zeros((PACK, vocab_pad, PACK * H), jnp.float32)   # (4, Vp, 128)
    for g in range(PACK):
        tbl_bd = tbl_bd.at[g, :vocab, g * H:(g + 1) * H].set(genre_tbl)

    grp = jnp.arange(PACK * H) // H
    gmat = (grp[:, None] == grp[None, :]).astype(jnp.float32) / H  # (128, 128)
    gamma4 = jnp.tile(params["ln_gamma"], (1, PACK))               # (1, 128)
    beta4 = jnp.tile(params["ln_beta"], (1, PACK))                 # (1, 128)

    # --- row tiling over packed rows; no jnp.pad, edge block is masked ---------
    if n4 < 8:
        tn4 = n4                                   # block == full dim (tiny N)
    else:
        # cap so the grid has >=2 steps whenever possible (v7x: both TensorCores)
        tn4 = min(max(block_rows // PACK, 8), _round_up(pl.cdiv(n4, 2), 8))
    grid = (pl.cdiv(n4, tn4),)

    # VMEM limit from the *physical* (lane/sublane padded) footprint, 2x headroom,
    # clamped at 48 MiB so it also fits v7x's 64 MiB VMEM with Mosaic scratch.
    stream_bytes = (
        _phys_vmem_bytes((tn4, PACK * d_img), 4)
        + _phys_vmem_bytes((tn4, PACK * d_text), 4)
        + _phys_vmem_bytes((tn4, PACK * H), 4)
        + _phys_vmem_bytes((tn4, PACK), 4)
        + _phys_vmem_bytes((tn4, PACK * H), 4)     # output
    )
    resident_bytes = (
        _phys_vmem_bytes(w_img_bd.shape, 2)
        + _phys_vmem_bytes(w_text_bd.shape, 2)
        + _phys_vmem_bytes(tbl_bd.shape, 4)
        + _phys_vmem_bytes(gmat.shape, 4)
        + 2 * _phys_vmem_bytes((1, PACK * H), 4)
    )
    vmem_limit = int(min(48 << 20, max(8 << 20, 2 * (2 * stream_bytes + 2 * resident_bytes))))

    idx_row = lambda i: (i, 0)
    idx_fix = lambda i: (0, 0)

    out4 = pl.pallas_call(
        _linear_projector_kernel,
        out_shape=jax.ShapeDtypeStruct((n4, PACK * H), jnp.float32),
        grid_spec=pltpu.PrefetchScalarGridSpec(
            num_scalar_prefetch=0,
            grid=grid,
            in_specs=[
                pl.BlockSpec((tn4, PACK * d_img), idx_row),    # img stream
                pl.BlockSpec((tn4, PACK * d_text), idx_row),   # text stream
                pl.BlockSpec((tn4, PACK * H), idx_row),        # audio (ADD) stream
                pl.BlockSpec((tn4, PACK), idx_row),            # genre ids
                pl.BlockSpec((PACK * d_img, PACK * H), idx_fix),
                pl.BlockSpec((PACK * d_text, PACK * H), idx_fix),
                pl.BlockSpec((PACK, vocab_pad, PACK * H), lambda i: (0, 0, 0)),
                pl.BlockSpec((PACK * H, PACK * H), idx_fix),
                pl.BlockSpec((1, PACK * H), idx_fix),
                pl.BlockSpec((1, PACK * H), idx_fix),
            ],
            out_specs=pl.BlockSpec((tn4, PACK * H), idx_row),
        ),
        compiler_params=pltpu.CompilerParams(
            dimension_semantics=("parallel",),
            vmem_limit_bytes=vmem_limit,
        ),
    )(x_img4, x_text4, audio4, ids4, w_img_bd, w_text_bd, tbl_bd, gmat, gamma4, beta4)

    return out4.reshape(n_pad, H)[:N]   # free reshape + slice; drops any pad rows


def make_params(key, *, vocab, d_genre, d_img, d_text, hidden):
    ks = jax.random.split(key, 10)
    u = lambda k, shape, s=0.1: jax.random.uniform(k, shape, jnp.float32, -s, s)
    # Un-composed module parameters (fc weight spans concat = [genre|album|text],
    # stored split column-wise).  Composition happens in the wrapper.
    return {
        "genre_emb_table": u(ks[0], (vocab, d_genre), 1.0),
        "w_album_T": u(ks[1], (d_img, hidden)),
        "b_album": u(ks[2], (1, hidden)),
        "w_text_T": u(ks[3], (d_text, hidden)),
        "b_text": u(ks[4], (1, hidden)),
        "w_fc_genre_T": u(ks[5], (d_genre, hidden)),
        "w_fc_album_T": u(ks[6], (hidden, hidden)),
        "w_fc_text_T": u(ks[7], (hidden, hidden)),
        "b_fc": u(ks[8], (1, hidden)),
        "ln_gamma": jnp.ones((1, hidden), jnp.float32),
        "ln_beta": jnp.zeros((1, hidden), jnp.float32),
    }


def reference(genre_ids, img, txt, audio, p):
    """Plain-JAX f32 mirror of the PyTorch forward (for a loose tolerance check)."""
    genre = p["genre_emb_table"][genre_ids]
    album = img @ p["w_album_T"] + p["b_album"]
    text = txt @ p["w_text_T"] + p["b_text"]
    concat = jnp.concatenate([genre, album, text], axis=1)
    w_fc_T = jnp.concatenate(
        [p["w_fc_genre_T"], p["w_fc_album_T"], p["w_fc_text_T"]], axis=0)
    proj = audio + concat @ w_fc_T + p["b_fc"]
    mean = proj.mean(-1, keepdims=True)
    var = ((proj - mean) ** 2).mean(-1, keepdims=True)
    return (proj - mean) * jax.lax.rsqrt(var + 1e-5) * p["ln_gamma"] + p["ln_beta"]


if __name__ == "__main__":
    N, HIDDEN = 8, 32
    VOCAB, D_GENRE, D_IMG, D_TEXT = 10, 16, 24, 20

    key = jax.random.PRNGKey(0)
    k_par, k_gid, k_img, k_txt, k_aud = jax.random.split(key, 5)

    params = make_params(
        k_par, vocab=VOCAB, d_genre=D_GENRE, d_img=D_IMG, d_text=D_TEXT, hidden=HIDDEN
    )

    ndata = {
        "genre_id": jax.random.randint(k_gid, (N,), 0, VOCAB, dtype=jnp.int32),
        "img_emb": jax.random.normal(k_img, (N, D_IMG), jnp.float32),
        "track_name_emb": jax.random.normal(k_txt, (N, D_TEXT), jnp.float32),
        "audio_emb": jax.random.normal(k_aud, (N, HIDDEN), jnp.float32),
    }

    proj_fn = jax.jit(
        lambda gid, img, txt, aud: linear_projector(gid, img, txt, aud, params)
    )
    out = proj_fn(
        ndata["genre_id"], ndata["img_emb"], ndata["track_name_emb"], ndata["audio_emb"]
    )
    jax.block_until_ready(out)

    assert out.shape == (N, HIDDEN) and out.dtype == jnp.float32
    ref = reference(
        ndata["genre_id"], ndata["img_emb"], ndata["track_name_emb"],
        ndata["audio_emb"], params,
    )
    err = float(jnp.max(jnp.abs(out - ref)))
    assert err < 1e-1, f"kernel mismatch vs f32 reference: max|diff|={err}"
    print("KERNEL_OK")
</pallas_src>

<mosaic_0001>
module attributes {stable_mosaic.version = 11 : i64} {
  func.func @_linear_projector_kernel(%arg0: i32, %arg1: memref<2x96xf32, #tpu.memory_space<vmem>>, %arg2: memref<2x80xf32, #tpu.memory_space<vmem>>, %arg3: memref<2x128xf32, #tpu.memory_space<vmem>>, %arg4: memref<2x4xi32, #tpu.memory_space<vmem>>, %arg5: memref<96x128xbf16, #tpu.memory_space<vmem>>, %arg6: memref<80x128xbf16, #tpu.memory_space<vmem>>, %arg7: memref<4x16x128xf32, #tpu.memory_space<vmem>>, %arg8: memref<128x128xf32, #tpu.memory_space<vmem>>, %arg9: memref<1x128xf32, #tpu.memory_space<vmem>>, %arg10: memref<1x128xf32, #tpu.memory_space<vmem>>, %arg11: memref<2x128xf32, #tpu.memory_space<vmem>>) attributes {dimension_semantics = [#tpu.dimension_semantics<parallel>], iteration_bounds = array<i64: 1>, scalar_prefetch = 0 : i64, scratch_operands = 0 : i64, tpu.core_type = #tpu.core_type<tc>, window_params = [{transform_indices = @transform_0, window_bounds = array<i64: 2, 96>}, {transform_indices = @transform_1, window_bounds = array<i64: 2, 80>}, {transform_indices = @transform_2, window_bounds = array<i64: 2, 128>}, {transform_indices = @transform_3, window_bounds = array<i64: 2, 4>}, {pipeline_mode = #tpu.pipeline_mode<synchronous>, transform_indices = @transform_4, window_bounds = array<i64: 96, 128>}, {pipeline_mode = #tpu.pipeline_mode<synchronous>, transform_indices = @transform_5, window_bounds = array<i64: 80, 128>}, {pipeline_mode = #tpu.pipeline_mode<synchronous>, transform_indices = @transform_6, window_bounds = array<i64: 4, 16, 128>}, {pipeline_mode = #tpu.pipeline_mode<synchronous>, transform_indices = @transform_7, window_bounds = array<i64: 128, 128>}, {pipeline_mode = #tpu.pipeline_mode<synchronous>, transform_indices = @transform_8, window_bounds = array<i64: 1, 128>}, {pipeline_mode = #tpu.pipeline_mode<synchronous>, transform_indices = @transform_9, window_bounds = array<i64: 1, 128>}, {transform_indices = @transform_10, window_bounds = array<i64: 2, 128>}]} {
    %c0 = arith.constant 0 : index
    %c0_0 = arith.constant 0 : index
    %0 = vector.load %arg3[%c0, %c0_0] : memref<2x128xf32, #tpu.memory_space<vmem>>, vector<2x128xf32>
    %c0_1 = arith.constant 0 : index
    %c0_2 = arith.constant 0 : index
    %1 = vector.load %arg1[%c0_1, %c0_2] : memref<2x96xf32, #tpu.memory_space<vmem>>, vector<2x96xf32>
    %2 = arith.truncf %1 : vector<2x96xf32> to vector<2x96xbf16>
    %c0_3 = arith.constant 0 : index
    %c0_4 = arith.constant 0 : index
    %3 = vector.load %arg5[%c0_3, %c0_4] : memref<96x128xbf16, #tpu.memory_space<vmem>>, vector<96x128xbf16>
    %cst = arith.constant dense<0.000000e+00> : vector<2x128xf32>
    %4 = tpu.matmul %2, %3, %cst {dimension_numbers = #tpu.dot_dimension_numbers<[1], [0], [0], [1], [0, 0, 1, 1], [], []>} : vector<2x96xbf16>, vector<96x128xbf16>, vector<2x128xf32> -> vector<2x128xf32>
    %5 = arith.addf %0, %4 : vector<2x128xf32>
    %c0_5 = arith.constant 0 : index
    %c0_6 = arith.constant 0 : index
    %6 = vector.load %arg2[%c0_5, %c0_6] : memref<2x80xf32, #tpu.memory_space<vmem>>, vector<2x80xf32>
    %7 = arith.truncf %6 : vector<2x80xf32> to vector<2x80xbf16>
    %c0_7 = arith.constant 0 : index
    %c0_8 = arith.constant 0 : index
    %8 = vector.load %arg6[%c0_7, %c0_8] : memref<80x128xbf16, #tpu.memory_space<vmem>>, vector<80x128xbf16>
    %cst_9 = arith.constant dense<0.000000e+00> : vector<2x128xf32>
    %9 = tpu.matmul %7, %8, %cst_9 {dimension_numbers = #tpu.dot_dimension_numbers<[1], [0], [0], [1], [0, 0, 1, 1], [], []>} : vector<2x80xbf16>, vector<80x128xbf16>, vector<2x128xf32> -> vector<2x128xf32>
    %10 = arith.addf %5, %9 : vector<2x128xf32>
    %c0_10 = arith.constant 0 : index
    %c0_11 = arith.constant 0 : index
    %11 = vector.load %arg4[%c0_10, %c0_11] : memref<2x4xi32, #tpu.memory_space<vmem>>, vector<2x4xi32>
    %12 = tpu.iota {dimensions = array<i32: 1>} : vector<2x16xi32>
    %13 = vector.extract_strided_slice %11 {offsets = [0, 0], sizes = [2, 1], strides = [1, 1]} : vector<2x4xi32> to vector<2x1xi32>
    %14 = vector.broadcast %13 : vector<2x1xi32> to vector<2x16xi32>
    %15 = arith.cmpi eq, %14, %12 : vector<2x16xi32>
    %16 = arith.extui %15 : vector<2x16xi1> to vector<2x16xi32>
    %17 = arith.sitofp %16 : vector<2x16xi32> to vector<2x16xf32>
    %c0_12 = arith.constant 0 : index
    %c0_13 = arith.constant 0 : index
    %c0_14 = arith.constant 0 : index
    %18 = vector.load %arg7[%c0_12, %c0_13, %c0_14] : memref<4x16x128xf32, #tpu.memory_space<vmem>>, vector<1x16x128xf32>
    %19 = vector.shape_cast %18 : vector<1x16x128xf32> to vector<16x128xf32>
    %cst_15 = arith.constant dense<0.000000e+00> : vector<2x128xf32>
    %20 = tpu.matmul %17, %19, %cst_15 {dimension_numbers = #tpu.dot_dimension_numbers<[1], [0], [0], [1], [0, 0, 1, 1], [], []>} : vector<2x16xf32>, vector<16x128xf32>, vector<2x128xf32> -> vector<2x128xf32>
    %21 = arith.addf %10, %20 : vector<2x128xf32>
    %22 = vector.extract_strided_slice %11 {offsets = [0, 1], sizes = [2, 1], strides = [1, 1]} : vector<2x4xi32> to vector<2x1xi32>
    %23 = vector.broadcast %22 : vector<2x1xi32> to vector<2x16xi32>
    %24 = arith.cmpi eq, %23, %12 : vector<2x16xi32>
    %25 = arith.extui %24 : vector<2x16xi1> to vector<2x16xi32>
    %26 = arith.sitofp %25 : vector<2x16xi32> to vector<2x16xf32>
    %c1 = arith.constant 1 : index
    %c0_16 = arith.constant 0 : index
    %c0_17 = arith.constant 0 : index
    %27 = vector.load %arg7[%c1, %c0_16, %c0_17] : memref<4x16x128xf32, #tpu.memory_space<vmem>>, vector<1x16x128xf32>
    %28 = vector.shape_cast %27 : vector<1x16x128xf32> to vector<16x128xf32>
    %cst_18 = arith.constant dense<0.000000e+00> : vector<2x128xf32>
    %29 = tpu.matmul %26, %28, %cst_18 {dimension_numbers = #tpu.dot_dimension_numbers<[1], [0], [0], [1], [0, 0, 1, 1], [], []>} : vector<2x16xf32>, vector<16x128xf32>, vector<2x128xf32> -> vector<2x128xf32>
    %30 = arith.addf %21, %29 : vector<2x128xf32>
    %31 = vector.extract_strided_slice %11 {offsets = [0, 2], sizes = [2, 1], strides = [1, 1]} : vector<2x4xi32> to vector<2x1xi32>
    %32 = vector.broadcast %31 : vector<2x1xi32> to vector<2x16xi32>
    %33 = arith.cmpi eq, %32, %12 : vector<2x16xi32>
    %34 = arith.extui %33 : vector<2x16xi1> to vector<2x16xi32>
    %35 = arith.sitofp %34 : vector<2x16xi32> to vector<2x16xf32>
    %c2 = arith.constant 2 : index
    %c0_19 = arith.constant 0 : index
    %c0_20 = arith.constant 0 : index
    %36 = vector.load %arg7[%c2, %c0_19, %c0_20] : memref<4x16x128xf32, #tpu.memory_space<vmem>>, vector<1x16x128xf32>
    %37 = vector.shape_cast %36 : vector<1x16x128xf32> to vector<16x128xf32>
    %cst_21 = arith.constant dense<0.000000e+00> : vector<2x128xf32>
    %38 = tpu.matmul %35, %37, %cst_21 {dimension_numbers = #tpu.dot_dimension_numbers<[1], [0], [0], [1], [0, 0, 1, 1], [], []>} : vector<2x16xf32>, vector<16x128xf32>, vector<2x128xf32> -> vector<2x128xf32>
    %39 = arith.addf %30, %38 : vector<2x128xf32>
    %40 = vector.extract_strided_slice %11 {offsets = [0, 3], sizes = [2, 1], strides = [1, 1]} : vector<2x4xi32> to vector<2x1xi32>
    %41 = vector.broadcast %40 : vector<2x1xi32> to vector<2x16xi32>
    %42 = arith.cmpi eq, %41, %12 : vector<2x16xi32>
    %43 = arith.extui %42 : vector<2x16xi1> to vector<2x16xi32>
    %44 = arith.sitofp %43 : vector<2x16xi32> to vector<2x16xf32>
    %c3 = arith.constant 3 : index
    %c0_22 = arith.constant 0 : index
    %c0_23 = arith.constant 0 : index
    %45 = vector.load %arg7[%c3, %c0_22, %c0_23] : memref<4x16x128xf32, #tpu.memory_space<vmem>>, vector<1x16x128xf32>
    %46 = vector.shape_cast %45 : vector<1x16x128xf32> to vector<16x128xf32>
    %cst_24 = arith.constant dense<0.000000e+00> : vector<2x128xf32>
    %47 = tpu.matmul %44, %46, %cst_24 {dimension_numbers = #tpu.dot_dimension_numbers<[1], [0], [0], [1], [0, 0, 1, 1], [], []>} : vector<2x16xf32>, vector<16x128xf32>, vector<2x128xf32> -> vector<2x128xf32>
    %48 = arith.addf %39, %47 : vector<2x128xf32>
    %c0_25 = arith.constant 0 : index
    %c0_26 = arith.constant 0 : index
    %49 = vector.load %arg8[%c0_25, %c0_26] : memref<128x128xf32, #tpu.memory_space<vmem>>, vector<128x128xf32>
    %cst_27 = arith.constant dense<0.000000e+00> : vector<2x128xf32>
    %50 = tpu.matmul %48, %49, %cst_27 {dimension_numbers = #tpu.dot_dimension_numbers<[1], [0], [0], [1], [0, 0, 1, 1], [], []>} : vector<2x128xf32>, vector<128x128xf32>, vector<2x128xf32> -> vector<2x128xf32>
    %51 = arith.subf %48, %50 : vector<2x128xf32>
    %52 = arith.mulf %51, %51 : vector<2x128xf32>
    %c0_28 = arith.constant 0 : index
    %c0_29 = arith.constant 0 : index
    %53 = vector.load %arg8[%c0_28, %c0_29] : memref<128x128xf32, #tpu.memory_space<vmem>>, vector<128x128xf32>
    %cst_30 = arith.constant dense<0.000000e+00> : vector<2x128xf32>
    %54 = tpu.matmul %52, %53, %cst_30 {dimension_numbers = #tpu.dot_dimension_numbers<[1], [0], [0], [1], [0, 0, 1, 1], [], []>} : vector<2x128xf32>, vector<128x128xf32>, vector<2x128xf32> -> vector<2x128xf32>
    %cst_31 = arith.constant 9.99999974E-6 : f32
    %55 = vector.broadcast %cst_31 : f32 to vector<2x128xf32>
    %56 = arith.addf %54, %55 : vector<2x128xf32>
    %57 = math.rsqrt %56 : vector<2x128xf32>
    %58 = arith.mulf %51, %57 : vector<2x128xf32>
    %c0_32 = arith.constant 0 : index
    %c0_33 = arith.constant 0 : index
    %59 = vector.load %arg9[%c0_32, %c0_33] : memref<1x128xf32, #tpu.memory_space<vmem>>, vector<1x128xf32>
    %60 = vector.broadcast %59 : vector<1x128xf32> to vector<2x128xf32>
    %61 = arith.mulf %58, %60 : vector<2x128xf32>
    %c0_34 = arith.constant 0 : index
    %c0_35 = arith.constant 0 : index
    %62 = vector.load %arg10[%c0_34, %c0_35] : memref<1x128xf32, #tpu.memory_space<vmem>>, vector<1x128xf32>
    %63 = vector.broadcast %62 : vector<1x128xf32> to vector<2x128xf32>
    %64 = arith.addf %61, %63 : vector<2x128xf32>
    %c0_36 = arith.constant 0 : index
    %c0_37 = arith.constant 0 : index
    %65 = vector.load %arg11[%c0_36, %c0_37] : memref<2x128xf32, #tpu.memory_space<vmem>>, vector<2x128xf32>
    tpu.vector_store %arg11[%c0_36, %c0_37], %64 {strides = array<i32>} : memref<2x128xf32, #tpu.memory_space<vmem>>, vector<2x128xf32>,
    return
  }
  func.func @transform_0(%arg0: i32) -> (i32, i32) {
    %c0_i32 = arith.constant 0 : i32
    %c0_i32_0 = arith.constant 0 : i32
    return %arg0, %c0_i32 : i32, i32
  }
  func.func @transform_1(%arg0: i32) -> (i32, i32) {
    %c0_i32 = arith.constant 0 : i32
    %c0_i32_0 = arith.constant 0 : i32
    return %arg0, %c0_i32 : i32, i32
  }
  func.func @transform_2(%arg0: i32) -> (i32, i32) {
    %c0_i32 = arith.constant 0 : i32
    %c0_i32_0 = arith.constant 0 : i32
    return %arg0, %c0_i32 : i32, i32
  }
  func.func @transform_3(%arg0: i32) -> (i32, i32) {
    %c0_i32 = arith.constant 0 : i32
    %c0_i32_0 = arith.constant 0 : i32
    return %arg0, %c0_i32 : i32, i32
  }
  func.func @transform_4(%arg0: i32) -> (i32, i32) {
    %c0_i32 = arith.constant 0 : i32
    %c0_i32_0 = arith.constant 0 : i32
    %c0_i32_1 = arith.constant 0 : i32
    return %c0_i32, %c0_i32_0 : i32, i32
  }
  func.func @transform_5(%arg0: i32) -> (i32, i32) {
    %c0_i32 = arith.constant 0 : i32
    %c0_i32_0 = arith.constant 0 : i32
    %c0_i32_1 = arith.constant 0 : i32
    return %c0_i32, %c0_i32_0 : i32, i32
  }
  func.func @transform_6(%arg0: i32) -> (i32, i32, i32) {
    %c0_i32 = arith.constant 0 : i32
    %c0_i32_0 = arith.constant 0 : i32
    %c0_i32_1 = arith.constant 0 : i32
    %c0_i32_2 = arith.constant 0 : i32
    return %c0_i32, %c0_i32_0, %c0_i32_1 : i32, i32, i32
  }
  func.func @transform_7(%arg0: i32) -> (i32, i32) {
    %c0_i32 = arith.constant 0 : i32
    %c0_i32_0 = arith.constant 0 : i32
    %c0_i32_1 = arith.constant 0 : i32
    return %c0_i32, %c0_i32_0 : i32, i32
  }
  func.func @transform_8(%arg0: i32) -> (i32, i32) {
    %c0_i32 = arith.constant 0 : i32
    %c0_i32_0 = arith.constant 0 : i32
    %c0_i32_1 = arith.constant 0 : i32
    return %c0_i32, %c0_i32_0 : i32, i32
  }
  func.func @transform_9(%arg0: i32) -> (i32, i32) {
    %c0_i32 = arith.constant 0 : i32
    %c0_i32_0 = arith.constant 0 : i32
    %c0_i32_1 = arith.constant 0 : i32
    return %c0_i32, %c0_i32_0 : i32, i32
  }
  func.func @transform_10(%arg0: i32) -> (i32, i32) {
    %c0_i32 = arith.constant 0 : i32
    %c0_i32_0 = arith.constant 0 : i32
    return %arg0, %c0_i32 : i32, i32
  }
}

</mosaic_0001>

<bundles_post_ra>
// kernel: tile.2
= control target key start
LH: loop header
LB: loop body
LE: loop exit
PB: predicated region body
PF: predicated region fallthrough
CT: control target
= control target key end

     0   :  { %s20_s0 = inlined_call_operand.<no memory space> [shape: f32[], index: 0, kind: input, shape index: {}]   ;;  %s21_s1 = inlined_call_operand.vmem [shape: f32[1,128], index: 1, kind: output, shape index: {}]  }
   0x1   :  { %v2_v0 = vstv %s20_s0 }
   0x2   :  { %3 = vst [vmem:[%s21_s1] sm:$0x1] %v2_v0 }

// kernel: _lambda_.1
= control target key start
LH: loop header
LB: loop body
LE: loop exit
PB: predicated region body
PF: predicated region fallthrough
CT: control target
= control target key end

     0   :  { %v1043_v0 = vmov 1   ;;  %v1044_v1 = vmov 0   ;;  %v1045_v4 = vmov 0.0   ;;  %vm1046_vm0 = vmmov 0   ;;  %s1286_s3 = inlined_call_operand.vmem [shape: s32[2,4], index: 3, kind: input, shape index: {}]   ;;  %s1287_s4 = inlined_call_operand.vmem [shape: bf16[96,128], index: 4, kind: input, shape index: {}]   ;;  %s1288_s5 = inlined_call_operand.vmem [shape: bf16[80,128], index: 5, kind: input, shape index: {}]   ;;  %s1289_s1 = inlined_call_operand.vmem [shape: f32[2,80], index: 1, kind: input, shape index: {}]   ;;  %s1290_s6 = inlined_call_operand.vmem [shape: f32[4,16,128], index: 6, kind: input, shape index: {}]   ;;  %s1291_s0 = inlined_call_operand.vmem [shape: f32[2,96], index: 0, kind: input, shape index: {}]   ;;  %s1292_s7 = inlined_call_operand.vmem [shape: f32[128,128], index: 7, kind: input, shape index: {}]   ;;  %s1293_s2 = inlined_call_operand.vmem [shape: f32[2,128], index: 2, kind: input, shape index: {}]   ;;  %s1294_s8 = inlined_call_operand.vmem [shape: f32[1,128], index: 8, kind: input, shape index: {}]   ;;  %s1295_s9 = inlined_call_operand.vmem [shape: f32[1,128], index: 9, kind: input, shape index: {}]   ;;  %s1296_s10 = inlined_call_operand.vmem [shape: f32[2,128], index: 10, kind: output, shape index: {}]  }
   0x1   :  { %1025 = vset.pattern.permute.xlu0 %v1043_v0  ;;  %1027 = vset.pattern.permute.xlu1 %v1044_v1  ;;  %v219_v2 = vld [vmem:[%s1286_s3] sm:$0x3]  ;;  %v1032_v6 = vld [vmem:[%s1287_s4 + $0x8] sm:$0xff]   ;;  %v1047_v8 = vmov 2   ;;  %v1048_v9 = vmov 3   ;;  %v1034_v10 = vld [vmem:[%s1287_s4 + $0x10] sm:$0xff]   ;;  %v220_v28 = vlaneseq }
   0x2   :  { %v1030_v3 = vld [vmem:[%s1287_s4] sm:$0xff]   ;;  %223 = vperm.xlu1 %1027, %v219_v2   ;;  %306 = vperm.xlu0 %1025, %v219_v2   ;;  %v1033_v7 = vld [vmem:[%s1288_s5 + $0x8] sm:$0xff]   ;;  %v1035_v11 = vld [vmem:[%s1288_s5 + $0x10] sm:$0xff]   ;;  %vm174_vm1 = vcmask 654336   ;;  %v1049_v25 = vmov 0.0|0.0   ;;  %vm87_vm2 = vcmask 785408  }
   0x3   :  { %823 = vmatprep.subr.bf16.mxu0 %v1045_v4  ;;  %839 = vmatprep.subr.bf16.mxu1 %v1045_v4  ;;  %v1031_v5 = vld [vmem:[%s1288_s5] sm:$0xff]   ;;  %v1036_v12 = vld [vmem:[%s1287_s4 + $0x18] sm:$0xff]   ;;  %v751_v17 = vld [vmem:[%s1290_s6 + $0x10] sm:$0xff]  ;;  %v221_v29 = vand.u32 127, %v220_v28  ;;  %vm230_vm3 = vcmask 130048  }
   0x4   :  { %824 = vmatpush3.bf16.msra.mxu0 %v1030_v3  ;;  %849 = vmatprep.mubr.msk.bf16.mxu1 %vm1046_vm0, %v1045_v4  ;;  %v1037_v13 = vld [vmem:[%s1288_s5 + $0x18] sm:$0xff]   ;;  %v1038_v14 = vld [vmem:[%s1287_s4 + $0x20] sm:$0xff]   ;;  %v1040_v19 = vld [vmem:[%s1287_s4 + $0x28] sm:$0xff]  }
   0x5   :  { %825 = vmatprep.subr.bf16.mxu0 %v1045_v4  ;;  %840 = vmatpush3.bf16.msra.mxu1 %v1031_v5  ;;  %v1039_v15 = vld [vmem:[%s1288_s5 + $0x20] sm:$0xff]   ;;  %v752_v18 = vld [vmem:[%s1290_s6 + $0x18] sm:$0xff]  ;;  %v229_v24 = vld [vmem:[%s1290_s6 + $0x8] sm:$0xff] }
   0x6   :  { %1026 = vset.pattern.permute.xlu0 %v1047_v8  ;;  %1028 = vset.pattern.permute.xlu1 %v1048_v9  ;;  %v132_v16 = vld [vmem:[%s1289_s1] sm:$0x3]  ;;  %v955_v22 = vpack.c.bf16 %v752_v18, %v751_v17  ;;  %v756_v31 = vld [vmem:[%s1290_s6 + $0x28] sm:$0xff]  ;;  %v556_v40 = vld [vmem:[%s1292_s7 + $0x10] sm:$0xff] }
   0x7   :  { %389 = vperm.xlu0 %1026, %v219_v2   ;;  %472 = vperm.xlu1 %1028, %v219_v2   ;;  %v133_v20 = vpack.c.bf16 %v132_v16, %v132_v16  ;;  %v37_v21 = vld [vmem:[%s1291_s0] sm:$0x3]  ;;  %v555_v36 = vld [vmem:[%s1292_s7 + $0x8] sm:$0xff]  ;;  %v557_v41 = vld [vmem:[%s1292_s7 + $0x18] sm:$0xff] }
   0x8   :  { %826 = vmatpush3.bf16.msra.mxu0 %v1032_v6  ;;  %841 = vmatprep.subr.bf16.mxu1 %v1045_v4  ;;  %v228_v23 = vld [vmem:[%s1290_s6] sm:$0xff]  ;;  %v38_v26 = vpack.c.bf16 %v37_v21, %v37_v21  ;;  %v759_v43 = vld [vmem:[%s1290_s6 + $0x30] sm:$0xff]  ;;  %v760_v44 = vld [vmem:[%s1290_s6 + $0x38] sm:$0xff]  ;;  %v967_v45 = vpack.c.bf16 %v557_v41, %v556_v40 }
   0x9   :  { %827 = vmatprep.subr.bf16.mxu0 %v1045_v4  ;;  %842 = vmatpush3.bf16.msra.mxu1 %v1033_v7  ;;  %v952_v27 = vpack.c.bf16 %v229_v24, %v228_v23  ;;  %v755_v30 = vld [vmem:[%s1290_s6 + $0x20] sm:$0xff]  ;;  %v961_v47 = vpack.c.bf16 %v760_v44, %v759_v43  ;;  %v559_v49 = vld [vmem:[%s1292_s7 + $0x28] sm:$0xff]  ;;  %v560_v53 = vld [vmem:[%s1292_s7 + $0x30] sm:$0xff] }
   0xa   :  { %843 = vmatprep.subr.bf16.mxu1 %v1045_v4  ;;  %835 = vmatprep.mubr.msk.bf16.mxu0 %vm1046_vm0, %v1045_v4  ;;  %v958_v34 = vpack.c.bf16 %v756_v31, %v755_v30  ;;  %v554_v35 = vld [vmem:[%s1292_s7] sm:$0xff]  ;;  %v561_v54 = vld [vmem:[%s1292_s7 + $0x38] sm:$0xff]  ;;  %v563_v57 = vld [vmem:[%s1292_s7 + $0x48] sm:$0xff] }
   0xb   :  { %1029 = vset.pattern.permute.xlu0 %v1048_v9  ;;  %v964_v39 = vpack.c.bf16 %v555_v36, %v554_v35  ;;  %v558_v48 = vld [vmem:[%s1292_s7 + $0x20] sm:$0xff]  ;;  %v973_v55 = vpack.c.bf16 %v561_v54, %v560_v53  ;;  %v564_v58 = vld [vmem:[%s1292_s7 + $0x50] sm:$0xff]  ;;  %v565_v60 = vld [vmem:[%s1292_s7 + $0x58] sm:$0xff] }
   0xc   :  { %828 = vmatpush3.bf16.msra.mxu0 %v1034_v10  ;;  %v970_v51 = vpack.c.bf16 %v559_v49, %v558_v48  ;;  %v562_v56 = vld [vmem:[%s1292_s7 + $0x40] sm:$0xff]  ;;  %v979_v61 = vpack.c.bf16 %v565_v60, %v564_v58  ;;  %v567_v63 = vld [vmem:[%s1292_s7 + $0x68] sm:$0xff]  ;;  %v568_v1 = vld [vmem:[%s1292_s7 + $0x70] sm:$0xff] }
   0xd   :  { %829 = vmatprep.subr.bf16.mxu0 %v1045_v4  ;;  %844 = vmatpush3.bf16.msra.mxu1 %v1035_v11  ;;  %v976_v59 = vpack.c.bf16 %v563_v57, %v562_v56  ;;  %v566_v62 = vld [vmem:[%s1292_s7 + $0x60] sm:$0xff]  ;;  %v569_v2 = vld [vmem:[%s1292_s7 + $0x78] sm:$0xff] }
   0xe   :  { %845 = vmatprep.subr.bf16.mxu1 %v1045_v4  ;;  %v982_v0 = vpack.c.bf16 %v567_v63, %v566_v62  ;;  %v985_v3 = vpack.c.bf16 %v569_v2, %v568_v1  ;;  %v36_v5 = vld [vmem:[%s1293_s2] sm:$0x3] }
   0xf   :  { %v763_v31 = vld [vmem:[%s1295_s9] ss:$0 sm:$0xff] }
  0x10   :  { %830 = vmatpush3.bf16.msra.mxu0 %v1036_v12 }
  0x11   :  { %831 = vmatprep.subr.bf16.mxu0 %v1045_v4  ;;  %846 = vmatpush3.bf16.msra.mxu1 %v1037_v13 }
  0x12   :  { %847 = vmatprep.subr.bf16.mxu1 %v1045_v4 }
  0x14   :  { %832 = vmatpush3.bf16.msra.mxu0 %v1038_v14 }
  0x15   :  { %833 = vmatprep.subr.bf16.mxu0 %v1045_v4  ;;  %848 = vmatpush3.bf16.msra.mxu1 %v1039_v15 }
  0x16   :  { %954 = vmatprep.subr.bf16.mxu1 %v1049_v25 }
  0x18   :  { %834 = vmatpush3.bf16.msra.mxu0 %v1040_v19  ;;  %850 = vmatmul.mubr.msk.bf16.vlgmr.msra.gmra.mrb[0].mxu1 %vm174_vm1, %v133_v20 }
  0x19   :  { %956 = vmatpush3.bf16.msra.mxu1 %v955_v22  ;;  %951 = vmatprep.subr.bf16.mxu0 %v1049_v25 }
  0x1a   :  { %864 = vmatprep.mubr.msk.f32.mxu1 %vm1046_vm0, %v1045_v4  ;;  %957 = vmatprep.subr.bf16.mxu1 %v1049_v25 }
  0x1b   :  { %836 = vmatmul.mubr.msk.bf16.vlgmr.msra.gmra.mrb[0].mxu0 %vm87_vm2, %v38_v26 }
  0x1c   :  { %953 = vmatpush3.bf16.msra.mxu0 %v952_v27  ;;  %857 = vmatprep.mubr.msk.f32.mxu0 %vm1046_vm0, %v1045_v4 }
  0x1d   :  { %987 = vmatprep.subr.bf16.mxu0 %v1049_v25 }
  0x81   :  { %v224_v32 = vpop.permute.xlu1 %223  ;;  %v307_v33 = vpop.permute.xlu0 %306 }
  0x82   :  { %vm225_vm4 = vcmp.eq.s32.totalorder %v224_v32, %v221_v29  ;;  %vm308_vm5 = vcmp.eq.s32.totalorder %v307_v33, %v221_v29 }
  0x83   :  { %v748_v37 = vsel %vm225_vm4, 1.0, %v1045_v4  ;;  %v750_v38 = vsel %vm308_vm5, 1.0, %v1045_v4 }
  0x84   :  { %858 = vmatmul.mubr.msk.f32.vlgmr.msra.gmra.mrb[4].mxu0 %vm230_vm3, %v748_v37  ;;  %865 = vmatmul.mubr.msk.f32.vlgmr.msra.gmra.mrb[4].mxu1 %vm230_vm3, %v750_v38 }
  0x85   :  { %959 = vmatpush3.bf16.msra.mxu1 %v958_v34  ;;  %871 = vmatprep.mubr.msk.f32.mxu1 %vm1046_vm0, %v1045_v4 }
  0x86   :  { %v390_v42 = vpop.permute.xlu0 %389  ;;  %960 = vmatprep.subr.bf16.mxu1 %v1049_v25  ;;  %989 = vmatpush3.bf16.msra.mxu0 %v964_v39  ;;  %v473_v50 = vpop.permute.xlu1 %472 }
  0x87   :  { %vm391_vm6 = vcmp.eq.s32.totalorder %v390_v42, %v221_v29  ;;  %990 = vmatprep.subr.bf16.mxu0 %v1049_v25  ;;  %948 = vmatprep.mubr.msk.f32.mxu0 %vm1046_vm0, %v1045_v4  ;;  %vm474_vm7 = vcmp.eq.s32.totalorder %v473_v50, %v221_v29  ;;  %v762_v29 = vld [vmem:[%s1294_s8] ss:$0 sm:$0xff] }
  0x88   :  { %v754_v46 = vsel %vm391_vm6, 1.0, %v1045_v4  ;;  %v758_v52 = vsel %vm474_vm7, 1.0, %v1045_v4 }
  0x8a   :  { %992 = vmatpush3.bf16.msra.mxu0 %v967_v45 }
  0x8b   :  { %993 = vmatprep.subr.bf16.mxu0 %v1049_v25 }
  0x8c   :  { %872 = vmatmul.mubr.msk.f32.vlgmr.msra.gmra.mrb[4].mxu1 %vm230_vm3, %v754_v46 }
  0x8d   :  { %962 = vmatpush3.bf16.msra.mxu1 %v961_v47  ;;  %878 = vmatprep.mubr.msk.f32.mxu1 %vm1046_vm0, %v1045_v4 }
  0x8e   :  { %963 = vmatprep.subr.bf16.mxu1 %v1049_v25  ;;  %995 = vmatpush3.bf16.msra.mxu0 %v970_v51 }
  0x8f   :  { %996 = vmatprep.subr.bf16.mxu0 %v1049_v25 }
  0x92   :  { %998 = vmatpush3.bf16.msra.mxu0 %v973_v55 }
  0x93   :  { %999 = vmatprep.subr.bf16.mxu0 %v1049_v25 }
  0x94   :  { %879 = vmatmul.mubr.msk.f32.vlgmr.msra.gmra.mrb[4].mxu1 %vm230_vm3, %v758_v52 }
  0x95   :  { %965 = vmatpush3.bf16.msra.mxu1 %v964_v39  ;;  %913 = vmatprep.mubr.msk.f32.mxu1 %vm1046_vm0, %v1045_v4 }
  0x96   :  { %966 = vmatprep.subr.bf16.mxu1 %v1049_v25  ;;  %1001 = vmatpush3.bf16.msra.mxu0 %v976_v59 }
  0x97   :  { %1002 = vmatprep.subr.bf16.mxu0 %v1049_v25 }
  0x99   :  { %968 = vmatpush3.bf16.msra.mxu1 %v967_v45 }
  0x9a   :  { %969 = vmatprep.subr.bf16.mxu1 %v1049_v25  ;;  %1004 = vmatpush3.bf16.msra.mxu0 %v979_v61 }
  0x9b   :  { %1005 = vmatprep.subr.bf16.mxu0 %v1049_v25 }
  0x9d   :  { %971 = vmatpush3.bf16.msra.mxu1 %v970_v51 }
  0x9e   :  { %972 = vmatprep.subr.bf16.mxu1 %v1049_v25  ;;  %1007 = vmatpush3.bf16.msra.mxu0 %v982_v0 }
  0x9f   :  { %1008 = vmatprep.subr.bf16.mxu0 %v1049_v25 }
  0xa1   :  { %974 = vmatpush3.bf16.msra.mxu1 %v973_v55 }
  0xa2   :  { %975 = vmatprep.subr.bf16.mxu1 %v1049_v25  ;;  %1010 = vmatpush3.bf16.msra.mxu0 %v985_v3 }
  0xa5   :  { %977 = vmatpush3.bf16.msra.mxu1 %v976_v59 }
  0xa6   :  { %978 = vmatprep.subr.bf16.mxu1 %v1049_v25 }
  0xa9   :  { %980 = vmatpush3.bf16.msra.mxu1 %v979_v61 }
  0xaa   :  { %981 = vmatprep.subr.bf16.mxu1 %v1049_v25 }
  0xad   :  { %983 = vmatpush3.bf16.msra.mxu1 %v982_v0 }
  0xae   :  { %984 = vmatprep.subr.bf16.mxu1 %v1049_v25 }
  0xb1   :  { %986 = vmatpush3.bf16.msra.mxu1 %v985_v3 }
  0xeb   :  { %v212_v4 = vpop.f32.mrb[0].mxu1 }
  0xec   :  { %v851_v6 = vpop.f32.mrb[1].mxu1 }
  0xed   :  { %v215_v7 = vpop.f32.mrb[2].mxu1 }
  0xee   :  { %v125_v8 = vpop.f32.mrb[0].mxu0  ;;  %v852_v9 = vpop.f32.mrb[3].mxu1 }
  0xef   :  { %v131_v10 = vadd.f32 %v125_v8, %v36_v5  ;;  %v837_v11 = vpop.f32.mrb[1].mxu0 }
  0xf0   :  { %v128_v12 = vpop.f32.mrb[2].mxu0 }
  0xf1   :  { %v838_v13 = vpop.f32.mrb[3].mxu0  ;;  %v218_v14 = vadd.f32 %v212_v4, %v131_v10 }
 0x157   :  { %v300_v15 = vpop.f32.mrb[4].mxu0 }
 0x158   :  { %v304_v16 = vadd.f32 %v300_v15, %v218_v14  ;;  %v859_v17 = vpop.f32.mrb[5].mxu0 }
 0x167   :  { %v549_v18 = vpop.f32.mrb[4].mxu1 }
 0x168   :  { %v1013_v19 = vadd.f32 %v549_v18, %v304_v16  ;;  %v880_v20 = vpop.f32.mrb[5].mxu1 }
 0x16a   :  { %914 = vmatmul.mubr.f32.vlgmr.msra.gmra.mrb[6].mxu1 %v1013_v19 }
 0x23d   :  { %v636_v21 = vpop.f32.mrb[6].mxu1 }
 0x23e   :  { %v640_v22 = vsub.f32 %v1013_v19, %v636_v21  ;;  %v915_v23 = vpop.f32.mrb[7].mxu1 }
 0x240   :  { %v641_v24 = vmul.f32 %v640_v22, %v640_v22 }
 0x242   :  { %949 = vmatmul.mubr.f32.vlgmr.msra.gmra.mrb[6].mxu0 %v641_v24 }
 0x315   :  { %v708_v25 = vpop.f32.mrb[6].mxu0 }
 0x316   :  { %v709_v26 = vadd.f32 1e-05, %v708_v25  ;;  %v950_v27 = vpop.f32.mrb[7].mxu0 }
 0x318   :  { %1041 = vrsqrt.f32 %v709_v26 }
 0x322   :  { %v1042_v28 = vpop.eup %1041 }
 0x323   :  { %v713_v30 = vmul.f32 %v1042_v28, %v640_v22 }
 0x325   :  { %v721_v32 = vmul.f32 %v762_v29, %v713_v30 }
 0x327   :  { %v729_v33 = vadd.f32 %v763_v31, %v721_v32 }
 0x329   :  { %730 = vst [vmem:[%s1296_s10] sm:$0x3] %v729_v33 }

</bundles_post_ra>
